<compile_context>
chip_gen: v6e
topology: v6e:2x2x1
jax: 0.10.0
libtpu: 0.0.40
codegen_flags: <defaults>
</compile_context>

<pallas_src>
import functools

import numpy as np
import jax
import jax.numpy as jnp
from jax.experimental import pallas as pl
from jax.experimental.pallas import tpu as pltpu

try:  # fast C implementation if present; pure-numpy fallback otherwise
    from scipy.optimize import linear_sum_assignment as _scipy_lsa
except Exception:  # pragma: no cover
    _scipy_lsa = None

ALPHA = 0.25
GAMMA = 2.0   # exploited as an explicit square inside the kernel
EPS = 1e-8    # only used by the numpy reference (torch semantics)


def _round_up(x, m):
    return ((x + m - 1) // m) * m


# ----------------------------- Pallas kernel ------------------------------ #
def _cost_kernel(logits_t_ref, qbox_t_ref, onehot_t_ref, tbox_ref, out_ref,
                 *, w_class, w_bbox, w_giou):
    # logits_t_ref : (C, TN)   logits, classes on sublanes, queries on lanes
    # qbox_t_ref   : (4, TN)   query boxes cxcywh, queries on lanes
    # onehot_t_ref : (TP, C)   one-hot of concatenated target class ids
    # tbox_ref     : (TP, 4)   target boxes cxcywh
    # out_ref      : (TP, TN)  transposed cost-matrix tile  C^T[t, n]
    x = logits_t_ref[...]

    # One shared exponential for sigmoid and both softplus terms:
    #   e = exp(-|x|);  softplus(x) = max(x,0) + log(1+e);  softplus(-x) = softplus(x) - x
    #   sigmoid(x) = 1/(1+e) if x>=0 else e/(1+e)
    e = jnp.exp(-jnp.abs(x))
    sp_pos = jnp.maximum(x, 0.0) + jnp.log(1.0 + e)     # = -log(1 - p)
    sp_neg = sp_pos - x                                  # = -log(p)
    r = 1.0 / (1.0 + e)
    p = jnp.where(x >= 0.0, r, e * r)
    one_m_p = 1.0 - p

    # Focal classification cost; gamma == 2 -> explicit squaring on the VPU.
    neg = (1.0 - ALPHA) * (p * p) * sp_pos
    pos = ALPHA * (one_m_p * one_m_p) * sp_neg
    focal_t = w_class * (pos - neg)                      # (C, TN), weight folded in
    # Per-target class cost gathered via one-hot matmul (MXU): (TP,C)x(C,TN).
    cost_class_t = jnp.dot(onehot_t_ref[...], focal_t,
                           preferred_element_type=jnp.float32)      # (TP, TN)

    qb = qbox_t_ref[...]                                 # (4, TN)
    tb = tbox_ref[...]                                   # (TP, 4)
    qcx, qcy, qw, qh = qb[0:1, :], qb[1:2, :], qb[2:3, :], qb[3:4, :]       # (1, TN)
    tcx, tcy, tw, th = tb[:, 0:1], tb[:, 1:2], tb[:, 2:3], tb[:, 3:4]       # (TP, 1)

    # L1 cdist over the 4 box coords, broadcast (TP,1) x (1,TN)
    cost_bbox = (jnp.abs(tcx - qcx) + jnp.abs(tcy - qcy) +
                 jnp.abs(tw - qw) + jnp.abs(th - qh))

    # cxcywh -> xyxy
    qx0, qy0 = qcx - 0.5 * qw, qcy - 0.5 * qh
    qx1, qy1 = qcx + 0.5 * qw, qcy + 0.5 * qh
    tx0, ty0 = tcx - 0.5 * tw, tcy - 0.5 * th
    tx1, ty1 = tcx + 0.5 * tw, tcy + 0.5 * th

    iw = jnp.maximum(jnp.minimum(qx1, tx1) - jnp.maximum(qx0, tx0), 0.0)
    ih = jnp.maximum(jnp.minimum(qy1, ty1) - jnp.maximum(qy0, ty0), 0.0)
    inter = iw * ih                                      # (TP, TN)
    union = qw * qh + tw * th - inter

    ew = jnp.maximum(qx1, tx1) - jnp.minimum(qx0, tx0)
    eh = jnp.maximum(qy1, ty1) - jnp.minimum(qy0, ty0)
    enclose = jnp.maximum(ew, 0.0) * jnp.maximum(eh, 0.0)

    # Exact divides (the approximate reciprocals previously broke the 2e-3
    # tolerance and could flip near-tie assignments).
    iou = inter / union
    giou = iou - (enclose - union) / enclose

    out_ref[...] = (w_bbox * cost_bbox + cost_class_t -
                    w_giou * giou).astype(jnp.float32)


def compute_cost_matrix(pred_logits, pred_boxes, tgt_ids, tgt_bbox, *,
                        cost_class=1.0, cost_bbox=1.0, cost_giou=1.0,
                        target_tile_n=512):
    """Returns C of shape (bs, num_queries, num_targets_total), f32."""
    bs, num_queries, num_classes = pred_logits.shape
    n = bs * num_queries
    t = int(tgt_ids.shape[0])

    # ---- transposed layout: targets on sublanes, queries on lanes ----------
    t_pad = _round_up(max(t, 1), 8)           # targets pad only to 8 now
    n128 = _round_up(n, 128)

    # Pick the grid step count first (>=4 when possible so v7x's two
    # TensorCores both get balanced work), then derive a 128-aligned lane tile.
    max_steps = n128 // 128
    steps = max(1, min(max_steps, max(4, pl.cdiv(n128, target_tile_n))))
    tile_n = _round_up(pl.cdiv(n128, steps), 128)

    # VMEM guard: keep double-buffered streaming blocks well under the scoped
    # limit (v7x only has 64 MiB physical VMEM).
    def _footprint(tn):
        stream = 2 * (num_classes + 4 + t_pad) * tn * 4     # double-buffered tiles
        fixed = 2 * t_pad * (num_classes + 4) * 4           # broadcast inputs
        return stream + fixed
    while tile_n > 128 and _footprint(tile_n) > 24 * 1024 * 1024:
        tile_n -= 128

    steps = pl.cdiv(n128, tile_n)
    n_pad = steps * tile_n

    f32 = jnp.float32
    # Transposed feeds (classes / box coords on sublanes, queries on lanes).
    logits_t = jnp.pad(pred_logits.reshape(n, num_classes).astype(f32).T,
                       ((0, 0), (0, n_pad - n)))                      # (C, n_pad)
    qbox_t = jnp.pad(pred_boxes.reshape(n, 4).astype(f32).T,
                     ((0, 0), (0, n_pad - n)))                        # (4, n_pad)

    # One-hot of target ids: zero rows for padded targets -> padding is inert
    # in the class-cost matmul.  Padded targets get a finite dummy box so the
    # GIoU divides never see 0/0 on padded rows.
    dummy_box = jnp.array([0.5, 0.5, 0.2, 0.2], f32)
    onehot_t = jnp.pad(jax.nn.one_hot(tgt_ids, num_classes, dtype=f32),
                       ((0, t_pad - t), (0, 0)))                      # (t_pad, C)
    tbox = jnp.concatenate(
        [tgt_bbox.astype(f32),
         jnp.tile(dummy_box[None, :], (t_pad - t, 1))], axis=0)       # (t_pad, 4)

    kernel = functools.partial(_cost_kernel, w_class=float(cost_class),
                               w_bbox=float(cost_bbox), w_giou=float(cost_giou))

    c_t = pl.pallas_call(
        kernel,
        out_shape=jax.ShapeDtypeStruct((t_pad, n_pad), jnp.float32),
        grid_spec=pltpu.PrefetchScalarGridSpec(
            num_scalar_prefetch=0,
            grid=(n_pad // tile_n,),
            in_specs=[
                pl.BlockSpec((num_classes, tile_n), lambda i: (0, i)),
                pl.BlockSpec((4, tile_n), lambda i: (0, i)),
                pl.BlockSpec((t_pad, num_classes), lambda i: (0, 0)),
                pl.BlockSpec((t_pad, 4), lambda i: (0, 0)),
            ],
            out_specs=pl.BlockSpec((t_pad, tile_n), lambda i: (0, i)),
        ),
        compiler_params=pltpu.CompilerParams(
            dimension_semantics=("parallel",)),
    )(logits_t, qbox_t, onehot_t, tbox)

    # Slice off padding, transpose back to (N, T), reshape to (bs, nq, T).
    return c_t[:t, :n].T.reshape(bs, num_queries, t)


# --------------------- host-side Hungarian assignment --------------------- #
def _linear_sum_assignment_np(cost):
    """Minimal Jonker-Volgenant style rectangular assignment (scipy-compatible)."""
    cost = np.asarray(cost, dtype=np.float64)
    transposed = False
    if cost.shape[0] > cost.shape[1]:
        cost = cost.T
        transposed = True
    n, m = cost.shape
    u = np.zeros(n + 1); v = np.zeros(m + 1)
    p = np.zeros(m + 1, dtype=int); way = np.zeros(m + 1, dtype=int)
    for i in range(1, n + 1):
        p[0] = i; j0 = 0
        minv = np.full(m + 1, np.inf); used = np.zeros(m + 1, dtype=bool)
        while True:
            used[j0] = True
            i0 = p[j0]; delta = np.inf; j1 = -1
            for j in range(1, m + 1):
                if not used[j]:
                    cur = cost[i0 - 1, j - 1] - u[i0] - v[j]
                    if cur < minv[j]:
                        minv[j] = cur; way[j] = j0
                    if minv[j] < delta:
                        delta = minv[j]; j1 = j
            for j in range(m + 1):
                if used[j]:
                    u[p[j]] += delta; v[j] -= delta
                else:
                    minv[j] -= delta
            j0 = j1
            if p[j0] == 0:
                break
        while True:
            j1 = way[j0]; p[j0] = p[j1]; j0 = j1
            if j0 == 0:
                break
    rows, cols = [], []
    for j in range(1, m + 1):
        if p[j] != 0:
            rows.append(p[j] - 1); cols.append(j - 1)
    rows = np.asarray(rows, dtype=np.int64); cols = np.asarray(cols, dtype=np.int64)
    if transposed:
        rows, cols = cols, rows
    order = np.argsort(rows)
    return rows[order], cols[order]


def _lsa(cost):
    if _scipy_lsa is not None:
        r, c = _scipy_lsa(cost)
        return np.asarray(r, np.int64), np.asarray(c, np.int64)
    return _linear_sum_assignment_np(cost)


def hungarian_matcher(outputs, targets, group_detr=2,
                      cost_class=1.0, cost_bbox=1.0, cost_giou=1.0):
    """JAX/Pallas port of HungarianMatcher.forward."""
    bs, num_queries = outputs["pred_logits"].shape[:2]
    tgt_ids = jnp.concatenate([v["labels"] for v in targets])
    tgt_bbox = jnp.concatenate([v["boxes"] for v in targets])

    C = compute_cost_matrix(outputs["pred_logits"], outputs["pred_boxes"],
                            tgt_ids, tgt_bbox, cost_class=cost_class,
                            cost_bbox=cost_bbox, cost_giou=cost_giou)
    C = np.asarray(jax.block_until_ready(C))                  # (bs, nq, T)

    sizes = [int(v["boxes"].shape[0]) for v in targets]
    g_num_queries = num_queries // group_detr
    indices = []
    for g_i in range(group_detr):
        C_g = C[:, g_i * g_num_queries:(g_i + 1) * g_num_queries, :]
        indices_g = []
        col = 0
        for b, sz in enumerate(sizes):
            indices_g.append(_lsa(C_g[b, :, col:col + sz]))
            col += sz
        if g_i == 0:
            indices = indices_g
        else:
            indices = [(np.concatenate([i1[0], i2[0] + g_num_queries * g_i]),
                        np.concatenate([i1[1], i2[1]]))
                       for i1, i2 in zip(indices, indices_g)]
    # torch returns int64 tensors; we return int64 numpy arrays
    return [(np.asarray(i, np.int64), np.asarray(j, np.int64)) for i, j in indices]


# ------------------------------ reference --------------------------------- #
def _ref_cost_matrix(logits, boxes, tgt_ids, tgt_bbox, wc, wb, wg):
    logits = np.asarray(logits, np.float64)
    boxes = np.asarray(boxes, np.float64)
    tgt_bbox = np.asarray(tgt_bbox, np.float64)
    tgt_ids = np.asarray(tgt_ids)
    p = 1.0 / (1.0 + np.exp(-logits))
    neg = (1 - ALPHA) * p ** GAMMA * -np.log(1 - p + EPS)
    pos = ALPHA * (1 - p) ** GAMMA * -np.log(p + EPS)
    cost_class = pos[:, tgt_ids] - neg[:, tgt_ids]
    cost_bbox = np.abs(boxes[:, None, :] - tgt_bbox[None, :, :]).sum(-1)

    def to_xyxy(b):
        cx, cy, w, h = b[..., 0], b[..., 1], b[..., 2], b[..., 3]
        return np.stack([cx - 0.5 * w, cy - 0.5 * h, cx + 0.5 * w, cy + 0.5 * h], -1)
    a, b = to_xyxy(boxes), to_xyxy(tgt_bbox)
    area_a = (a[:, 2] - a[:, 0]) * (a[:, 3] - a[:, 1])
    area_b = (b[:, 2] - b[:, 0]) * (b[:, 3] - b[:, 1])
    lt = np.maximum(a[:, None, :2], b[None, :, :2])
    rb = np.minimum(a[:, None, 2:], b[None, :, 2:])
    wh = np.clip(rb - lt, 0, None)
    inter = wh[..., 0] * wh[..., 1]
    union = area_a[:, None] + area_b[None, :] - inter
    iou = inter / union
    lt2 = np.minimum(a[:, None, :2], b[None, :, :2])
    rb2 = np.maximum(a[:, None, 2:], b[None, :, 2:])
    wh2 = np.clip(rb2 - lt2, 0, None)
    enclose = wh2[..., 0] * wh2[..., 1]
    giou = iou - (enclose - union) / enclose
    return wb * cost_bbox + wc * cost_class + wg * (-giou)


if __name__ == "__main__":
    key = jax.random.PRNGKey(0)
    bs, num_queries, num_classes = 2, 8, 8
    k1, k2, k3, k4, k5 = jax.random.split(key, 5)

    pred_logits = jax.random.normal(k1, (bs, num_queries, num_classes), jnp.float32)
    centers = 0.3 + 0.4 * jax.random.uniform(k2, (bs, num_queries, 2))
    whs = 0.1 + 0.3 * jax.random.uniform(k3, (bs, num_queries, 2))
    pred_boxes = jnp.concatenate([centers, whs], axis=-1).astype(jnp.float32)

    sizes = [2, 3]
    targets = []
    for b, sz in enumerate(sizes):
        kk1, kk2, k4 = jax.random.split(k4, 3)
        t_centers = 0.3 + 0.4 * jax.random.uniform(kk1, (sz, 2))
        t_whs = 0.1 + 0.3 * jax.random.uniform(kk2, (sz, 2))
        kk3, k5 = jax.random.split(k5)
        labels = jax.random.randint(kk3, (sz,), 0, num_classes)
        targets.append({"labels": labels,
                        "boxes": jnp.concatenate([t_centers, t_whs], -1).astype(jnp.float32)})

    outputs = {"pred_logits": pred_logits, "pred_boxes": pred_boxes}

    # kernel cost matrix vs float64 numpy reference (torch semantics)
    tgt_ids = jnp.concatenate([t["labels"] for t in targets])
    tgt_bbox = jnp.concatenate([t["boxes"] for t in targets])
    C = compute_cost_matrix(pred_logits, pred_boxes, tgt_ids, tgt_bbox)
    C = jax.block_until_ready(C)
    C_ref = _ref_cost_matrix(
        np.asarray(pred_logits).reshape(-1, num_classes),
        np.asarray(pred_boxes).reshape(-1, 4),
        np.asarray(tgt_ids), np.asarray(tgt_bbox), 1.0, 1.0, 1.0,
    ).reshape(bs, num_queries, -1)
    np.testing.assert_allclose(np.asarray(C), C_ref, rtol=2e-3, atol=2e-3)

    # full matcher (Pallas cost matrix + host Hungarian)
    indices = hungarian_matcher(outputs, targets, group_detr=2)
    assert len(indices) == bs
    for (i_idx, j_idx), sz in zip(indices, sizes):
        assert len(i_idx) == len(j_idx) == 2 * sz  # group_detr groups concatenated

    print("KERNEL_OK")
</pallas_src>

<mosaic_0001>
module attributes {stable_mosaic.version = 11 : i64} {
  func.func @_cost_kernel(%arg0: i32, %arg1: memref<8x128xf32, #tpu.memory_space<vmem>>, %arg2: memref<4x128xf32, #tpu.memory_space<vmem>>, %arg3: memref<8x8xf32, #tpu.memory_space<vmem>>, %arg4: memref<8x4xf32, #tpu.memory_space<vmem>>, %arg5: memref<8x128xf32, #tpu.memory_space<vmem>>) attributes {dimension_semantics = [#tpu.dimension_semantics<parallel>], iteration_bounds = array<i64: 1>, scalar_prefetch = 0 : i64, scratch_operands = 0 : i64, tpu.core_type = #tpu.core_type<tc>, window_params = [{transform_indices = @transform_0, window_bounds = array<i64: 8, 128>}, {transform_indices = @transform_1, window_bounds = array<i64: 4, 128>}, {pipeline_mode = #tpu.pipeline_mode<synchronous>, transform_indices = @transform_2, window_bounds = array<i64: 8, 8>}, {pipeline_mode = #tpu.pipeline_mode<synchronous>, transform_indices = @transform_3, window_bounds = array<i64: 8, 4>}, {transform_indices = @transform_4, window_bounds = array<i64: 8, 128>}]} {
    %c0 = arith.constant 0 : index
    %c0_0 = arith.constant 0 : index
    %0 = vector.load %arg1[%c0, %c0_0] : memref<8x128xf32, #tpu.memory_space<vmem>>, vector<8x128xf32>
    %1 = math.absf %0 : vector<8x128xf32>
    %cst = arith.constant 0.000000e+00 : f32
    %2 = vector.broadcast %cst : f32 to vector<8x128xf32>
    %3 = arith.subf %2, %1 : vector<8x128xf32>
    %4 = math.exp %3 : vector<8x128xf32>
    %cst_1 = arith.constant 0.000000e+00 : f32
    %5 = vector.broadcast %cst_1 : f32 to vector<8x128xf32>
    %6 = arith.maximumf %0, %5 : vector<8x128xf32>
    %cst_2 = arith.constant 1.000000e+00 : f32
    %7 = vector.broadcast %cst_2 : f32 to vector<8x128xf32>
    %8 = arith.addf %7, %4 : vector<8x128xf32>
    %9 = math.log %8 : vector<8x128xf32>
    %10 = arith.addf %6, %9 : vector<8x128xf32>
    %11 = arith.subf %10, %0 : vector<8x128xf32>
    %cst_3 = arith.constant 1.000000e+00 : f32
    %12 = vector.broadcast %cst_3 : f32 to vector<8x128xf32>
    %13 = arith.addf %12, %4 : vector<8x128xf32>
    %cst_4 = arith.constant 1.000000e+00 : f32
    %14 = vector.broadcast %cst_4 : f32 to vector<8x128xf32>
    %15 = arith.divf %14, %13 : vector<8x128xf32>
    %cst_5 = arith.constant 0.000000e+00 : f32
    %16 = vector.broadcast %cst_5 : f32 to vector<8x128xf32>
    %17 = arith.cmpf oge, %0, %16 : vector<8x128xf32>
    %18 = arith.mulf %4, %15 : vector<8x128xf32>
    %19 = arith.select %17, %15, %18 : vector<8x128xi1>, vector<8x128xf32>
    %cst_6 = arith.constant 1.000000e+00 : f32
    %20 = vector.broadcast %cst_6 : f32 to vector<8x128xf32>
    %21 = arith.subf %20, %19 : vector<8x128xf32>
    %22 = arith.mulf %19, %19 : vector<8x128xf32>
    %cst_7 = arith.constant 7.500000e-01 : f32
    %23 = vector.broadcast %cst_7 : f32 to vector<8x128xf32>
    %24 = arith.mulf %23, %22 : vector<8x128xf32>
    %25 = arith.mulf %24, %10 : vector<8x128xf32>
    %26 = arith.mulf %21, %21 : vector<8x128xf32>
    %cst_8 = arith.constant 2.500000e-01 : f32
    %27 = vector.broadcast %cst_8 : f32 to vector<8x128xf32>
    %28 = arith.mulf %27, %26 : vector<8x128xf32>
    %29 = arith.mulf %28, %11 : vector<8x128xf32>
    %30 = arith.subf %29, %25 : vector<8x128xf32>
    %cst_9 = arith.constant 1.000000e+00 : f32
    %31 = vector.broadcast %cst_9 : f32 to vector<8x128xf32>
    %32 = arith.mulf %31, %30 : vector<8x128xf32>
    %c0_10 = arith.constant 0 : index
    %c0_11 = arith.constant 0 : index
    %33 = vector.load %arg3[%c0_10, %c0_11] : memref<8x8xf32, #tpu.memory_space<vmem>>, vector<8x8xf32>
    %cst_12 = arith.constant dense<0.000000e+00> : vector<8x128xf32>
    %34 = tpu.matmul %33, %32, %cst_12 {dimension_numbers = #tpu.dot_dimension_numbers<[1], [0], [0], [1], [0, 0, 1, 1], [], []>} : vector<8x8xf32>, vector<8x128xf32>, vector<8x128xf32> -> vector<8x128xf32>
    %c0_13 = arith.constant 0 : index
    %c0_14 = arith.constant 0 : index
    %35 = vector.load %arg2[%c0_13, %c0_14] : memref<4x128xf32, #tpu.memory_space<vmem>>, vector<4x128xf32>
    %c0_15 = arith.constant 0 : index
    %c0_16 = arith.constant 0 : index
    %36 = vector.load %arg4[%c0_15, %c0_16] : memref<8x4xf32, #tpu.memory_space<vmem>>, vector<8x4xf32>
    %37 = vector.extract_strided_slice %35 {offsets = [0, 0], sizes = [1, 128], strides = [1, 1]} : vector<4x128xf32> to vector<1x128xf32>
    %38 = vector.extract_strided_slice %35 {offsets = [1, 0], sizes = [1, 128], strides = [1, 1]} : vector<4x128xf32> to vector<1x128xf32>
    %39 = vector.extract_strided_slice %35 {offsets = [2, 0], sizes = [1, 128], strides = [1, 1]} : vector<4x128xf32> to vector<1x128xf32>
    %40 = vector.extract_strided_slice %35 {offsets = [3, 0], sizes = [1, 128], strides = [1, 1]} : vector<4x128xf32> to vector<1x128xf32>
    %41 = vector.extract_strided_slice %36 {offsets = [0, 0], sizes = [8, 1], strides = [1, 1]} : vector<8x4xf32> to vector<8x1xf32>
    %42 = vector.extract_strided_slice %36 {offsets = [0, 1], sizes = [8, 1], strides = [1, 1]} : vector<8x4xf32> to vector<8x1xf32>
    %43 = vector.extract_strided_slice %36 {offsets = [0, 2], sizes = [8, 1], strides = [1, 1]} : vector<8x4xf32> to vector<8x1xf32>
    %44 = vector.extract_strided_slice %36 {offsets = [0, 3], sizes = [8, 1], strides = [1, 1]} : vector<8x4xf32> to vector<8x1xf32>
    %45 = vector.broadcast %41 : vector<8x1xf32> to vector<8x128xf32>
    %46 = vector.broadcast %37 : vector<1x128xf32> to vector<8x128xf32>
    %47 = arith.subf %45, %46 : vector<8x128xf32>
    %48 = math.absf %47 : vector<8x128xf32>
    %49 = vector.broadcast %42 : vector<8x1xf32> to vector<8x128xf32>
    %50 = vector.broadcast %38 : vector<1x128xf32> to vector<8x128xf32>
    %51 = arith.subf %49, %50 : vector<8x128xf32>
    %52 = math.absf %51 : vector<8x128xf32>
    %53 = arith.addf %48, %52 : vector<8x128xf32>
    %54 = vector.broadcast %43 : vector<8x1xf32> to vector<8x128xf32>
    %55 = vector.broadcast %39 : vector<1x128xf32> to vector<8x128xf32>
    %56 = arith.subf %54, %55 : vector<8x128xf32>
    %57 = math.absf %56 : vector<8x128xf32>
    %58 = arith.addf %53, %57 : vector<8x128xf32>
    %59 = vector.broadcast %44 : vector<8x1xf32> to vector<8x128xf32>
    %60 = vector.broadcast %40 : vector<1x128xf32> to vector<8x128xf32>
    %61 = arith.subf %59, %60 : vector<8x128xf32>
    %62 = math.absf %61 : vector<8x128xf32>
    %63 = arith.addf %58, %62 : vector<8x128xf32>
    %cst_17 = arith.constant 5.000000e-01 : f32
    %64 = vector.broadcast %cst_17 : f32 to vector<1x128xf32>
    %65 = arith.mulf %64, %39 : vector<1x128xf32>
    %66 = arith.subf %37, %65 : vector<1x128xf32>
    %cst_18 = arith.constant 5.000000e-01 : f32
    %67 = vector.broadcast %cst_18 : f32 to vector<1x128xf32>
    %68 = arith.mulf %67, %40 : vector<1x128xf32>
    %69 = arith.subf %38, %68 : vector<1x128xf32>
    %cst_19 = arith.constant 5.000000e-01 : f32
    %70 = vector.broadcast %cst_19 : f32 to vector<1x128xf32>
    %71 = arith.mulf %70, %39 : vector<1x128xf32>
    %72 = arith.addf %37, %71 : vector<1x128xf32>
    %cst_20 = arith.constant 5.000000e-01 : f32
    %73 = vector.broadcast %cst_20 : f32 to vector<1x128xf32>
    %74 = arith.mulf %73, %40 : vector<1x128xf32>
    %75 = arith.addf %38, %74 : vector<1x128xf32>
    %cst_21 = arith.constant 5.000000e-01 : f32
    %76 = vector.broadcast %cst_21 : f32 to vector<8x1xf32>
    %77 = arith.mulf %76, %43 : vector<8x1xf32>
    %78 = arith.subf %41, %77 : vector<8x1xf32>
    %cst_22 = arith.constant 5.000000e-01 : f32
    %79 = vector.broadcast %cst_22 : f32 to vector<8x1xf32>
    %80 = arith.mulf %79, %44 : vector<8x1xf32>
    %81 = arith.subf %42, %80 : vector<8x1xf32>
    %cst_23 = arith.constant 5.000000e-01 : f32
    %82 = vector.broadcast %cst_23 : f32 to vector<8x1xf32>
    %83 = arith.mulf %82, %43 : vector<8x1xf32>
    %84 = arith.addf %41, %83 : vector<8x1xf32>
    %cst_24 = arith.constant 5.000000e-01 : f32
    %85 = vector.broadcast %cst_24 : f32 to vector<8x1xf32>
    %86 = arith.mulf %85, %44 : vector<8x1xf32>
    %87 = arith.addf %42, %86 : vector<8x1xf32>
    %88 = vector.broadcast %72 : vector<1x128xf32> to vector<8x128xf32>
    %89 = vector.broadcast %84 : vector<8x1xf32> to vector<8x128xf32>
    %90 = arith.minimumf %88, %89 : vector<8x128xf32>
    %91 = vector.broadcast %66 : vector<1x128xf32> to vector<8x128xf32>
    %92 = vector.broadcast %78 : vector<8x1xf32> to vector<8x128xf32>
    %93 = arith.maximumf %91, %92 : vector<8x128xf32>
    %94 = arith.subf %90, %93 : vector<8x128xf32>
    %cst_25 = arith.constant 0.000000e+00 : f32
    %95 = vector.broadcast %cst_25 : f32 to vector<8x128xf32>
    %96 = arith.maximumf %94, %95 : vector<8x128xf32>
    %97 = vector.broadcast %75 : vector<1x128xf32> to vector<8x128xf32>
    %98 = vector.broadcast %87 : vector<8x1xf32> to vector<8x128xf32>
    %99 = arith.minimumf %97, %98 : vector<8x128xf32>
    %100 = vector.broadcast %69 : vector<1x128xf32> to vector<8x128xf32>
    %101 = vector.broadcast %81 : vector<8x1xf32> to vector<8x128xf32>
    %102 = arith.maximumf %100, %101 : vector<8x128xf32>
    %103 = arith.subf %99, %102 : vector<8x128xf32>
    %cst_26 = arith.constant 0.000000e+00 : f32
    %104 = vector.broadcast %cst_26 : f32 to vector<8x128xf32>
    %105 = arith.maximumf %103, %104 : vector<8x128xf32>
    %106 = arith.mulf %96, %105 : vector<8x128xf32>
    %107 = arith.mulf %39, %40 : vector<1x128xf32>
    %108 = arith.mulf %43, %44 : vector<8x1xf32>
    %109 = vector.broadcast %107 : vector<1x128xf32> to vector<8x128xf32>
    %110 = vector.broadcast %108 : vector<8x1xf32> to vector<8x128xf32>
    %111 = arith.addf %109, %110 : vector<8x128xf32>
    %112 = arith.subf %111, %106 : vector<8x128xf32>
    %113 = vector.broadcast %72 : vector<1x128xf32> to vector<8x128xf32>
    %114 = vector.broadcast %84 : vector<8x1xf32> to vector<8x128xf32>
    %115 = arith.maximumf %113, %114 : vector<8x128xf32>
    %116 = vector.broadcast %66 : vector<1x128xf32> to vector<8x128xf32>
    %117 = vector.broadcast %78 : vector<8x1xf32> to vector<8x128xf32>
    %118 = arith.minimumf %116, %117 : vector<8x128xf32>
    %119 = arith.subf %115, %118 : vector<8x128xf32>
    %120 = vector.broadcast %75 : vector<1x128xf32> to vector<8x128xf32>
    %121 = vector.broadcast %87 : vector<8x1xf32> to vector<8x128xf32>
    %122 = arith.maximumf %120, %121 : vector<8x128xf32>
    %123 = vector.broadcast %69 : vector<1x128xf32> to vector<8x128xf32>
    %124 = vector.broadcast %81 : vector<8x1xf32> to vector<8x128xf32>
    %125 = arith.minimumf %123, %124 : vector<8x128xf32>
    %126 = arith.subf %122, %125 : vector<8x128xf32>
    %cst_27 = arith.constant 0.000000e+00 : f32
    %127 = vector.broadcast %cst_27 : f32 to vector<8x128xf32>
    %128 = arith.maximumf %119, %127 : vector<8x128xf32>
    %cst_28 = arith.constant 0.000000e+00 : f32
    %129 = vector.broadcast %cst_28 : f32 to vector<8x128xf32>
    %130 = arith.maximumf %126, %129 : vector<8x128xf32>
    %131 = arith.mulf %128, %130 : vector<8x128xf32>
    %132 = arith.divf %106, %112 : vector<8x128xf32>
    %133 = arith.subf %131, %112 : vector<8x128xf32>
    %134 = arith.divf %133, %131 : vector<8x128xf32>
    %135 = arith.subf %132, %134 : vector<8x128xf32>
    %cst_29 = arith.constant 1.000000e+00 : f32
    %136 = vector.broadcast %cst_29 : f32 to vector<8x128xf32>
    %137 = arith.mulf %136, %63 : vector<8x128xf32>
    %138 = arith.addf %137, %34 : vector<8x128xf32>
    %cst_30 = arith.constant 1.000000e+00 : f32
    %139 = vector.broadcast %cst_30 : f32 to vector<8x128xf32>
    %140 = arith.mulf %139, %135 : vector<8x128xf32>
    %141 = arith.subf %138, %140 : vector<8x128xf32>
    %c0_31 = arith.constant 0 : index
    %c0_32 = arith.constant 0 : index
    %142 = vector.load %arg5[%c0_31, %c0_32] : memref<8x128xf32, #tpu.memory_space<vmem>>, vector<8x128xf32>
    tpu.vector_store %arg5[%c0_31, %c0_32], %141 {strides = array<i32>} : memref<8x128xf32, #tpu.memory_space<vmem>>, vector<8x128xf32>,
    return
  }
  func.func @transform_0(%arg0: i32) -> (i32, i32) {
    %c0_i32 = arith.constant 0 : i32
    %c0_i32_0 = arith.constant 0 : i32
    return %c0_i32, %arg0 : i32, i32
  }
  func.func @transform_1(%arg0: i32) -> (i32, i32) {
    %c0_i32 = arith.constant 0 : i32
    %c0_i32_0 = arith.constant 0 : i32
    return %c0_i32, %arg0 : i32, i32
  }
  func.func @transform_2(%arg0: i32) -> (i32, i32) {
    %c0_i32 = arith.constant 0 : i32
    %c0_i32_0 = arith.constant 0 : i32
    %c0_i32_1 = arith.constant 0 : i32
    return %c0_i32, %c0_i32_0 : i32, i32
  }
  func.func @transform_3(%arg0: i32) -> (i32, i32) {
    %c0_i32 = arith.constant 0 : i32
    %c0_i32_0 = arith.constant 0 : i32
    %c0_i32_1 = arith.constant 0 : i32
    return %c0_i32, %c0_i32_0 : i32, i32
  }
  func.func @transform_4(%arg0: i32) -> (i32, i32) {
    %c0_i32 = arith.constant 0 : i32
    %c0_i32_0 = arith.constant 0 : i32
    return %c0_i32, %arg0 : i32, i32
  }
}

</mosaic_0001>

<bundles_post_ra>
// kernel: tpu_custom_call.1
= control target key start
LH: loop header
LB: loop body
LE: loop exit
PB: predicated region body
PF: predicated region fallthrough
CT: control target
= control target key end

     0   :  { %9 = vsyncpa [#allocation3], 0  ;;  %s417_s0 = inlined_call_operand.vmem [shape: f32[8,128], index: 0, kind: input, shape index: {}]   ;;  %s418_s1 = inlined_call_operand.vmem [shape: f32[4,128], index: 1, kind: input, shape index: {}]   ;;  %s419_s2 = inlined_call_operand.hbm [shape: f32[8,8], index: 2, kind: input, shape index: {}]   ;;  %s420_s3 = inlined_call_operand.vmem [shape: f32[8,4], index: 3, kind: input, shape index: {}]   ;;  %s421_s4 = inlined_call_operand.hbm [shape: f32[8,128], index: 4, kind: output, shape index: {}]  }
   0x1   :  { %10 = vsyncpa [#allocation4], 0  ;;  %s364_s15 = smov [#allocation2]  }
   0x2   :  { %s21_s16 = sshll.u32 %s364_s15, 4  ;;  %s22_s16 = int_to_ptr.vmem [resolvable:$true] %s21_s16 }
   0x3   :  { %s328_s17 = scalar_lea.vmem %s22_s16, 128  ;;  %p333_p1 = scmp.lt.s32.totalorder %s22_s16, %s22_s16 }
   0x4   :  { %p329_p0 = scmp.ne.s32.totalorder %s22_s16, %s328_s17  ;;  %p334_p2 = scmp.lt.s32.totalorder %s328_s17, %s328_s17 }
   0x6   :  { %p335_p3 = por %p334_p2, %p333_p1 }
   0x8   :  { %p336_p4 = pnand %p335_p3, %p329_p0 }
   0xa   :  { %339 = shalt.err (!%p336_p4)
}
   0xb   :  { %24 = dma.hbm_to_vmem [thread:$0]  %s419_s2, 128, %s22_s16, [#allocation3]  }
   0xc   :  { %360 = dma.done.wait [#allocation3], 128  }
   0xd   :  { %361 = vsyncadd [#allocation3], 4294967168  ;;  %v365_v0 = vmov 0.0   ;;  %vm366_vm0 = vmmov 0   ;;  %v367_v1 = vmov 1   ;;  %v368_v2 = vmov 0  }
   0xe   :  { %286 = vmatprep.subr.mxu0 %v365_v0  ;;  %288 = vmatprep.mubr.msk.f32.mxu0 %vm366_vm0, %v365_v0  ;;  %v130_v3 = vld [vmem:[%s420_s3] sm:$0xff]  ;;  %s369_s2 = smov 126   ;;  %s370_s24 = smov 127   ;;  %vm55_vm2 = vcmask 64512   ;;  %v371_v32 = vmov 3   ;;  %v372_v34 = vmov 2   ;;  %v136_v36 = vlaneseq }
   0xf   :  { %302 = vset.pattern.permute.xlu0 %v367_v1  ;;  %301 = vset.pattern.permute.xlu1 %v368_v2  ;;  %v30_v4 = vld [vmem:[%s417_s0] sm:$0xff]  ;;  %v181_v5 = vmul.f32 0.5, %v130_v3 }
  0x10   :  { %v31_v6 = vand.u32 2147483647, %v30_v4  ;;  %v35_v11 = vmax.f32 %v30_v4, 0.0  ;;  %vm43_vm1 = vcmp.ge.f32.partialorder %v30_v4, 0.0  ;;  %v54_v27 = vld [vmem:[#allocation2] sm:$0xff]  ;;  %v137_v38 = vshrl.u32 %v136_v36, 7 }
  0x11   :  { %183 = vrot.lane.b32.xlu0 %v181_v5, %s369_s2  ;;  %v129_v35 = vld [vmem:[%s418_s1] sm:$0xf]  ;;  %s373_s1 = smov [#allocation5]  }
  0x12   :  { %v32_v7 = vsub.f32 0.0, %v31_v6  ;;  %v175_v37 = vmul.f32 0.5, %v129_v35  ;;  %v138_v41 = vsub.s32 0, %v137_v38  ;;  %v148_v44 = vsub.s32 1, %v137_v38  ;;  %s274_s25 = sshll.u32 %s373_s1, 4  ;;  %s275_s25 = int_to_ptr.vmem [resolvable:$true] %s274_s25 }
  0x13   :  { %v232_v47 = vrot.slane %v129_v35, 1  ;;  %v159_v56 = vsub.s32 2, %v137_v38  ;;  %s340_s26 = scalar_lea.vmem %s275_s25, 128  ;;  %p345_p6 = scmp.lt.s32.totalorder %s275_s25, %s275_s25 }
  0x14   :  { %v33_v8 = vmul.f32 1.442695, %v32_v7  ;;  %v177_v39 = vrot.slane %v175_v37, 2  ;;  %v139_v6 = vrot.slane %v129_v35, %v138_v41  ;;  %p341_p5 = scmp.ne.s32.totalorder %s275_s25, %s340_s26  ;;  %p346_p7 = scmp.lt.s32.totalorder %s340_s26, %s340_s26 }
  0x15   :  { %235 = vrot.lane.b32.xlu0 %v130_v3, %s370_s24  ;;  %v234_v57 = vmul.f32 %v232_v47, %v129_v35 }
  0x16   :  { %310 = vpow2.f32 %v33_v8  ;;  %v179_v40 = vsub.f32 %v129_v35, %v177_v39  ;;  %v180_v43 = vadd.f32 %v177_v39, %v129_v35  ;;  %p347_p8 = por %p346_p7, %p345_p6 }
  0x18   :  { %v201_v46 = vrot.slane %v179_v40, %v138_v41  ;;  %v191_v49 = vrot.slane %v180_v43, %v138_v41  ;;  %v213_v51 = vrot.slane %v180_v43, %v148_v44  ;;  %v222_v55 = vrot.slane %v179_v40, %v148_v44  ;;  %p348_p9 = pnand %p347_p8, %p341_p5 }
  0x23   :  { %v311_v9 = vpop.eup %310 }
  0x24   :  { %v36_v10 = vadd.f32 1.0, %v311_v9 }
  0x26   :  { %312 = vlog2.f32 %v36_v10 }
  0x27   :  { %314 = vrcp.f32 %v36_v10 }
  0x33   :  { %v313_v12 = vpop.eup %312 }
  0x34   :  { %v315_v13 = vpop.eup %314  ;;  %v38_v14 = vmul.f32 0.6931472, %v313_v12 }
  0x35   :  { %v44_v15 = vmul.f32 %v315_v13, %v311_v9 }
  0x36   :  { %v39_v16 = vadd.f32 %v38_v14, %v35_v11 }
  0x37   :  { %v45_v17 = vsel %vm43_vm1, %v315_v13, %v44_v15 }
  0x38   :  { %v46_v18 = vsub.f32 1.0, %v45_v17  ;;  %v47_v19 = vmul.f32 %v45_v17, %v45_v17  ;;  %v40_v20 = vsub.f32 %v39_v16, %v30_v4  ;;  %v170_v17 = vsub.s32 3, %v137_v38 }
  0x3a   :  { %v48_v21 = vmul.f32 0.75, %v47_v19  ;;  %v50_v22 = vmul.f32 %v46_v18, %v46_v18 }
  0x3c   :  { %v49_v23 = vmul.f32 %v48_v21, %v39_v16  ;;  %v51_v24 = vmul.f32 0.25, %v50_v22  ;;  %v149_v16 = vrot.slane %v129_v35, %v148_v44  ;;  %v171_v22 = vrot.slane %v129_v35, %v170_v17 }
  0x3e   :  { %v52_v25 = vmul.f32 %v51_v24, %v40_v20  ;;  %v160_v24 = vrot.slane %v129_v35, %v159_v56 }
  0x40   :  { %v53_v26 = vsub.f32 %v52_v25, %v49_v23 }
  0x42   :  { %287 = vmatpush3.msra.mxu0 %v53_v26 }
  0x43   :  { %289 = vmatmul.mubr.msk.f32.vlgmr.msra.gmra.mxu0 %vm55_vm2, %v54_v27 }
  0x83   :  { %v184_v28 = vpop.permute.xlu0 %183 }
  0x84   :  { %v187_v29 = vadd.f32 %v184_v28, %v130_v3  ;;  %v186_v30 = vsub.f32 %v130_v3, %v184_v28 }
  0x86   :  { %215 = vperm.xlu0 %302, %v187_v29   ;;  %194 = vperm.xlu1 %301, %v187_v29  }
  0x87   :  { %v236_v31 = vpop.permute.xlu0 %235 }
  0x88   :  { %v238_v33 = vmul.f32 %v236_v31, %v130_v3 }
  0x8a   :  { %204 = vperm.xlu1 %301, %v186_v30   ;;  %305 = vset.pattern.permute.xlu0 %v368_v2 }
  0x8b   :  { %133 = vperm.xlu0 %305, %v130_v3  }
  0x8e   :  { %303 = vset.pattern.permute.xlu1 %v367_v1 }
  0x8f   :  { %224 = vperm.xlu1 %303, %v186_v30   ;;  %308 = vset.pattern.permute.xlu0 %v371_v32 }
  0x90   :  { %165 = vperm.xlu0 %308, %v130_v3  }
  0x93   :  { %304 = vset.pattern.permute.xlu1 %v372_v34 }
  0x94   :  { %245 = vperm.xlu1 %304, %v238_v33   ;;  %309 = vset.pattern.permute.xlu0 %v372_v34 }
  0x98   :  { %306 = vset.pattern.permute.xlu1 %v367_v1 }
  0x99   :  { %143 = vperm.xlu1 %306, %v130_v3  }
  0x9d   :  { %307 = vset.pattern.permute.xlu1 %v372_v34 }
  0x9e   :  { %154 = vperm.xlu1 %307, %v130_v3   ;;  %v242_v3 = vrot.slane %v234_v57, %v159_v56 }
 0x101   :  { %v195_v42 = vpop.permute.xlu1 %194  ;;  %v216_v52 = vpop.permute.xlu0 %215 }
 0x102   :  { %v197_v58 = vmin.f32 %v191_v49, %v195_v42  ;;  %v250_v59 = vmax.f32 %v191_v49, %v195_v42  ;;  %v218_v60 = vmin.f32 %v213_v51, %v216_v52  ;;  %v253_v61 = vmax.f32 %v213_v51, %v216_v52 }
 0x103   :  { %v411_v45 = vpop.f32.mrf.mxu0 }
 0x105   :  { %v290_v48 = vpop.f32.mrf.mxu0  ;;  %v205_v50 = vpop.permute.xlu1 %204 }
 0x106   :  { %v207_v53 = vmax.f32 %v201_v46, %v205_v50  ;;  %v251_v54 = vmin.f32 %v201_v46, %v205_v50  ;;  %v134_v12 = vpop.permute.xlu0 %133 }
 0x107   :  { %v140_v18 = vsub.f32 %v134_v12, %v139_v6 }
 0x108   :  { %v208_v63 = vsub.f32 %v197_v58, %v207_v53  ;;  %v252_v0 = vsub.f32 %v250_v59, %v251_v54 }
 0x109   :  { %v141_v23 = vand.u32 2147483647, %v140_v18 }
 0x10a   :  { %v225_v62 = vpop.permute.xlu1 %224  ;;  %v209_v7 = vmax.f32 %v208_v63, 0.0  ;;  %v256_v8 = vmax.f32 %v252_v0, 0.0 }
 0x10b   :  { %v227_v1 = vmax.f32 %v222_v55, %v225_v62  ;;  %v254_v2 = vmin.f32 %v222_v55, %v225_v62  ;;  %v166_v25 = vpop.permute.xlu0 %165 }
 0x10c   :  { %v172_v28 = vsub.f32 %v166_v25, %v171_v22 }
 0x10d   :  { %v228_v4 = vsub.f32 %v218_v60, %v227_v1  ;;  %v255_v5 = vsub.f32 %v253_v61, %v254_v2 }
 0x10e   :  { %v173_v32 = vand.u32 2147483647, %v172_v28 }
 0x10f   :  { %v229_v9 = vmax.f32 %v228_v4, 0.0  ;;  %v257_v10 = vmax.f32 %v255_v5, 0.0  ;;  %v246_v11 = vpop.permute.xlu1 %245 }
 0x110   :  { %v248_v13 = vadd.f32 %v246_v11, %v242_v3 }
 0x111   :  { %v258_v14 = vmul.f32 %v257_v10, %v256_v8  ;;  %v230_v15 = vmul.f32 %v229_v9, %v209_v7 }
 0x113   :  { %316 = vrcp.f32 %v258_v14  ;;  %v249_v19 = vsub.f32 %v248_v13, %v230_v15 }
 0x114   :  { %v144_v20 = vpop.permute.xlu1 %143 }
 0x115   :  { %318 = vrcp.f32 %v249_v19  ;;  %v150_v21 = vsub.f32 %v144_v20, %v149_v16  ;;  %v261_v36 = vsub.f32 %v258_v14, %v249_v19 }
 0x117   :  { %v151_v26 = vand.u32 2147483647, %v150_v21 }
 0x119   :  { %v155_v27 = vpop.permute.xlu1 %154  ;;  %v152_v29 = vadd.f32 %v151_v26, %v141_v23 }
 0x11a   :  { %v161_v30 = vsub.f32 %v155_v27, %v160_v24 }
 0x11c   :  { %v162_v31 = vand.u32 2147483647, %v161_v30 }
 0x11e   :  { %v163_v33 = vadd.f32 %v162_v31, %v152_v29 }
 0x120   :  { %v317_v34 = vpop.eup %316  ;;  %v174_v37 = vadd.f32 %v173_v32, %v163_v33 }
 0x121   :  { %v263_v40 = vmul.f32 %v317_v34, %v261_v36 }
 0x122   :  { %v319_v38 = vpop.eup %318  ;;  %v265_v35 = vadd.f32 %v174_v37, %v411_v45 }
 0x123   :  { %v260_v39 = vmul.f32 %v319_v38, %v230_v15 }
 0x125   :  { %v264_v41 = vsub.f32 %v260_v39, %v263_v40 }
 0x127   :  { %v266_v42 = vsub.f32 %v265_v35, %v264_v41 }
 0x129   :  { %267 = vst [vmem:[#allocation5] sm:$0xff] %v266_v42 }
 0x12a   :  { %351 = shalt.err (!%p348_p9)
}
 0x12b   :  { %277 = dma.vmem_to_hbm [thread:$0]  %s275_s25, 128, %s421_s4, [#allocation4]  }
 0x12c   :  { %362 = dma.done.wait [#allocation4], 128  }
 0x12d   :  { %363 = vsyncadd [#allocation4], 4294967168 }
 0x12e   :  { %281 = vsyncpa [#allocation3], 1 }
 0x12f   :  { %282 = vsyncpa [#allocation4], 1 }

</bundles_post_ra>
